<compile_context>
chip_gen: v7x
topology: tpu7x:2x2x1
jax: 0.10.0
libtpu: 0.0.40
codegen_flags: <defaults>
</compile_context>

<pallas_src>
import math

import jax
import jax.numpy as jnp
from jax.experimental import pallas as pl
from jax.experimental.pallas import tpu as pltpu


def _attn_kernel(q_ref, k_ref, v_ref, m_ref, o_ref, *, scale):
    # q_ref/k_ref/v_ref/o_ref: (BHblk, S, D);  m_ref: (S, S)
    q = q_ref[...]
    k = k_ref[...]
    v = v_ref[...]
    m = m_ref[...].astype(jnp.float32)

    # QK^T: contraction on the trailing dim of both operands (no transpose),
    # batched over the fused (batch*head) block, f32 accumulation on the MXU.
    s = jnp.einsum("bqd,bkd->bqk", q, k,
                   preferred_element_type=jnp.float32) * scale
    s = s + m  # (S, S) mask broadcasts over the fused batch/head block

    # Numerically stable softmax along the last axis.
    s = s - jnp.max(s, axis=-1, keepdims=True)
    p = jnp.exp(s)
    p = p * pl.reciprocal(jnp.sum(p, axis=-1, keepdims=True), approx=True)

    # PV matmul fed in the value dtype (bf16-native when inputs are bf16),
    # accumulated in f32.
    out = jnp.einsum("bqk,bkd->bqd", p.astype(v.dtype), v,
                     preferred_element_type=jnp.float32)
    o_ref[...] = out.astype(o_ref.dtype)


def _choose_bh_block(bh, s, d, itemsize, budget_bytes=2 * 1024 * 1024):
    """Largest divisor of bh whose per-step working set stays ~<= budget."""
    # rough per-(b,h) footprint: q,k,v,out blocks double-buffered + f32 scores
    per = 2 * 4 * s * d * itemsize + 2 * s * s * 4
    target = max(1, budget_bytes // per)
    blk = 1
    for cand in range(1, bh + 1):
        if bh % cand == 0 and cand <= target:
            blk = cand
    return blk


def masked_attention(q, k, v2, mask):
    """softmax(q @ k^T / sqrt(D) + mask) @ v2, batched over (batch, head)."""
    B, H, S, D = q.shape
    assert k.shape == (B, H, S, D) and v2.shape == (B, H, S, D)

    mask2d = jnp.reshape(mask, (S, S))  # (1, S, S) -> (S, S); broadcast in-kernel

    BH = B * H
    qf = q.reshape(BH, S, D)
    kf = k.reshape(BH, S, D)
    vf = v2.reshape(BH, S, D)

    bh_blk = _choose_bh_block(BH, S, D, q.dtype.itemsize)
    grid = (BH // bh_blk,)

    scale = 1.0 / math.sqrt(D)
    kernel = lambda qr, kr, vr, mr, orf: _attn_kernel(qr, kr, vr, mr, orf,
                                                      scale=scale)

    qkv_spec = pl.BlockSpec((bh_blk, S, D), lambda i: (i, 0, 0))
    mask_spec = pl.BlockSpec((S, S), lambda i: (0, 0))
    out_spec = pl.BlockSpec((bh_blk, S, D), lambda i: (i, 0, 0))

    out_flat = pl.pallas_call(
        kernel,
        out_shape=jax.ShapeDtypeStruct((BH, S, D), q.dtype),
        grid_spec=pltpu.PrefetchScalarGridSpec(
            num_scalar_prefetch=0,
            grid=grid,
            in_specs=[qkv_spec, qkv_spec, qkv_spec, mask_spec],
            out_specs=out_spec,
        ),
        compiler_params=pltpu.CompilerParams(
            dimension_semantics=("parallel",)),
    )(qf, kf, vf, mask2d)

    return out_flat.reshape(B, H, S, D)


def _reference(q, k, v2, mask):
    d = q.shape[-1]
    qk = jnp.einsum("bhsd,bhtd->bhst", q, k) / math.sqrt(d)
    qk = qk + mask  # (1, S, S) broadcasts over (B, H, S, S)
    w = jax.nn.softmax(qk, axis=-1)
    return jnp.einsum("bhst,bhtd->bhsd", w, v2)


if __name__ == "__main__":
    key = jax.random.PRNGKey(0)
    kq, kk, kv, km = jax.random.split(key, 4)

    B, H, S, D = 2, 4, 16, 32
    q = jax.random.normal(kq, (B, H, S, D), dtype=jnp.float32)
    k = jax.random.normal(kk, (B, H, S, D), dtype=jnp.float32)
    v2 = jax.random.normal(kv, (B, H, S, D), dtype=jnp.float32)
    # The PyTorch script builds an additive mask; we use a mix of 0 / -1e9 so
    # the softmax is not degenerate-uniform everywhere.
    mask = jnp.where(jax.random.uniform(km, (1, S, S)) > 0.7, -1e9, 0.0
                     ).astype(jnp.float32)

    out = masked_attention(q, k, v2, mask)
    out = jax.block_until_ready(out)

    ref = _reference(q, k, v2, mask)
    assert out.shape == (B, H, S, D)
    # tolerance loosened slightly because of pl.reciprocal(approx=True)
    assert jnp.allclose(out, ref, atol=5e-3, rtol=5e-3)
    print("KERNEL_OK")
</pallas_src>

<mosaic_0001>
module attributes {stable_mosaic.version = 11 : i64} {
  func.func @_lambda_(%arg0: i32, %arg1: memref<8x16x32xf32, #tpu.memory_space<vmem>>, %arg2: memref<8x16x32xf32, #tpu.memory_space<vmem>>, %arg3: memref<8x16x32xf32, #tpu.memory_space<vmem>>, %arg4: memref<16x16xf32, #tpu.memory_space<vmem>>, %arg5: memref<8x16x32xf32, #tpu.memory_space<vmem>>) attributes {dimension_semantics = [#tpu.dimension_semantics<parallel>], iteration_bounds = array<i64: 1>, scalar_prefetch = 0 : i64, scratch_operands = 0 : i64, tpu.core_type = #tpu.core_type<tc>, window_params = [{transform_indices = @transform_0, window_bounds = array<i64: 8, 16, 32>}, {transform_indices = @transform_1, window_bounds = array<i64: 8, 16, 32>}, {transform_indices = @transform_2, window_bounds = array<i64: 8, 16, 32>}, {pipeline_mode = #tpu.pipeline_mode<synchronous>, transform_indices = @transform_3, window_bounds = array<i64: 16, 16>}, {transform_indices = @transform_4, window_bounds = array<i64: 8, 16, 32>}]} {
    %c0 = arith.constant 0 : index
    %c0_0 = arith.constant 0 : index
    %c0_1 = arith.constant 0 : index
    %0 = vector.load %arg1[%c0, %c0_0, %c0_1] : memref<8x16x32xf32, #tpu.memory_space<vmem>>, vector<8x16x32xf32>
    %c0_2 = arith.constant 0 : index
    %c0_3 = arith.constant 0 : index
    %c0_4 = arith.constant 0 : index
    %1 = vector.load %arg2[%c0_2, %c0_3, %c0_4] : memref<8x16x32xf32, #tpu.memory_space<vmem>>, vector<8x16x32xf32>
    %c0_5 = arith.constant 0 : index
    %c0_6 = arith.constant 0 : index
    %c0_7 = arith.constant 0 : index
    %2 = vector.load %arg3[%c0_5, %c0_6, %c0_7] : memref<8x16x32xf32, #tpu.memory_space<vmem>>, vector<8x16x32xf32>
    %c0_8 = arith.constant 0 : index
    %c0_9 = arith.constant 0 : index
    %3 = vector.load %arg4[%c0_8, %c0_9] : memref<16x16xf32, #tpu.memory_space<vmem>>, vector<16x16xf32>
    "tpu.trace_start"() <{level = 10 : i32, message = "bqd,bkd->bqk"}> : () -> ()
    %cst = arith.constant dense<0.000000e+00> : vector<8x16x16xf32>
    %4 = tpu.matmul %0, %1, %cst {dimension_numbers = #tpu.dot_dimension_numbers<[2], [2], [1], [1], [0, 0, 0, 1, 1, 1], [0], [0]>} : vector<8x16x32xf32>, vector<8x16x32xf32>, vector<8x16x16xf32> -> vector<8x16x16xf32>
    "tpu.trace_stop"() : () -> ()
    %cst_10 = arith.constant 0.176776692 : f32
    %5 = vector.broadcast %cst_10 : f32 to vector<8x16x16xf32>
    %6 = arith.mulf %4, %5 : vector<8x16x16xf32>
    %7 = vector.shape_cast %3 : vector<16x16xf32> to vector<1x16x16xf32>
    %8 = vector.broadcast %7 : vector<1x16x16xf32> to vector<8x16x16xf32>
    %9 = arith.addf %6, %8 : vector<8x16x16xf32>
    %cst_11 = arith.constant dense<0xFF800000> : vector<8x16xf32>
    %10 = vector.multi_reduction <maximumf>, %9, %cst_11 [2] : vector<8x16x16xf32> to vector<8x16xf32>
    %11 = vector.shape_cast %10 : vector<8x16xf32> to vector<8x16x1xf32>
    %12 = vector.broadcast %11 : vector<8x16x1xf32> to vector<8x16x16xf32>
    %13 = arith.subf %9, %12 : vector<8x16x16xf32>
    %14 = math.exp %13 : vector<8x16x16xf32>
    %cst_12 = arith.constant dense<0.000000e+00> : vector<8x16xf32>
    %15 = vector.multi_reduction <add>, %14, %cst_12 [2] : vector<8x16x16xf32> to vector<8x16xf32>
    %16 = vector.shape_cast %15 : vector<8x16xf32> to vector<8x16x1xf32>
    %17 = tpu.reciprocal %16 {approx = true} : vector<8x16x1xf32> -> vector<8x16x1xf32>
    %18 = vector.broadcast %17 : vector<8x16x1xf32> to vector<8x16x16xf32>
    %19 = arith.mulf %14, %18 : vector<8x16x16xf32>
    "tpu.trace_start"() <{level = 10 : i32, message = "bqk,bkd->bqd"}> : () -> ()
    %cst_13 = arith.constant dense<0.000000e+00> : vector<8x16x32xf32>
    %20 = tpu.matmul %19, %2, %cst_13 {dimension_numbers = #tpu.dot_dimension_numbers<[2], [1], [1], [2], [0, 0, 0, 1, 1, 2], [0], [0]>} : vector<8x16x16xf32>, vector<8x16x32xf32>, vector<8x16x32xf32> -> vector<8x16x32xf32>
    "tpu.trace_stop"() : () -> ()
    %c0_14 = arith.constant 0 : index
    %c0_15 = arith.constant 0 : index
    %c0_16 = arith.constant 0 : index
    %21 = vector.load %arg5[%c0_14, %c0_15, %c0_16] : memref<8x16x32xf32, #tpu.memory_space<vmem>>, vector<8x16x32xf32>
    tpu.vector_store %arg5[%c0_14, %c0_15, %c0_16], %20 {strides = array<i32>} : memref<8x16x32xf32, #tpu.memory_space<vmem>>, vector<8x16x32xf32>,
    return
  }
  func.func @transform_0(%arg0: i32) -> (i32, i32, i32) {
    %c0_i32 = arith.constant 0 : i32
    %c0_i32_0 = arith.constant 0 : i32
    %c0_i32_1 = arith.constant 0 : i32
    return %arg0, %c0_i32, %c0_i32_0 : i32, i32, i32
  }
  func.func @transform_1(%arg0: i32) -> (i32, i32, i32) {
    %c0_i32 = arith.constant 0 : i32
    %c0_i32_0 = arith.constant 0 : i32
    %c0_i32_1 = arith.constant 0 : i32
    return %arg0, %c0_i32, %c0_i32_0 : i32, i32, i32
  }
  func.func @transform_2(%arg0: i32) -> (i32, i32, i32) {
    %c0_i32 = arith.constant 0 : i32
    %c0_i32_0 = arith.constant 0 : i32
    %c0_i32_1 = arith.constant 0 : i32
    return %arg0, %c0_i32, %c0_i32_0 : i32, i32, i32
  }
  func.func @transform_3(%arg0: i32) -> (i32, i32) {
    %c0_i32 = arith.constant 0 : i32
    %c0_i32_0 = arith.constant 0 : i32
    %c0_i32_1 = arith.constant 0 : i32
    return %c0_i32, %c0_i32_0 : i32, i32
  }
  func.func @transform_4(%arg0: i32) -> (i32, i32, i32) {
    %c0_i32 = arith.constant 0 : i32
    %c0_i32_0 = arith.constant 0 : i32
    %c0_i32_1 = arith.constant 0 : i32
    return %arg0, %c0_i32, %c0_i32_0 : i32, i32, i32
  }
}

</mosaic_0001>

<bundles_post_ra>
// kernel: tpu_custom_call.1
= control target key start
LH: loop header
LB: loop body
LE: loop exit
PB: predicated region body
PF: predicated region fallthrough
CT: control target
= control target key end

     0   :  { %9 = vsyncpa [#allocation3], 0  ;;  %s2592_s0 = inlined_call_operand.hbm [shape: f32[8,16,32], index: 0, kind: input, shape index: {}]   ;;  %s2593_s1 = inlined_call_operand.hbm [shape: f32[8,16,32], index: 1, kind: input, shape index: {}]   ;;  %s2594_s2 = inlined_call_operand.hbm [shape: f32[8,16,32], index: 2, kind: input, shape index: {}]   ;;  %s2595_s3 = inlined_call_operand.hbm [shape: f32[16,16], index: 3, kind: input, shape index: {}]   ;;  %s2596_s4 = inlined_call_operand.hbm [shape: f32[8,16,32], index: 4, kind: output, shape index: {}]  }
   0x1   :  { %10 = vsyncpa [#allocation6], 0 }
   0x2   :  { %11 = vsyncpa [#allocation9], 0 }
   0x3   :  { %12 = vsyncpa [#allocation4], 0  ;;  %s2205_s15 = smov [#allocation5]   ;;  %s2206_s17 = smov [#allocation2]  }
   0x4   :  { %s30_s16 = sshll.u32 %s2205_s15, 4  ;;  %s18_s18 = sshll.u32 %s2206_s17, 4  ;;  %s31_s16 = int_to_ptr.vmem [resolvable:$true] %s30_s16  ;;  %s2237_s18 = int_to_ptr.vmem [resolvable:$true] %s18_s18 }
   0x5   :  { %s2087_s21 = scalar_lea.hbm %s2593_s1, 2048 }
   0x6   :  { %p2088_p0 = scmp.ne.s32.totalorder %s2593_s1, %s2087_s21  ;;  %p2091_p1 = scmp.lt.u32.totalorder %s2087_s21, %s2593_s1 }
   0x8   :  { %p2093_p2 = pnand %p2091_p1, %p2088_p0 }
   0xa   :  { %2096 = shalt.err (!%p2093_p2)
}
   0xb   :  { %s2097_s26 = scalar_lea.vmem %s31_s16, 2048  ;;  %p2102_p4 = scmp.lt.s32.totalorder %s31_s16, %s31_s16 }
   0xc   :  { %p2098_p3 = scmp.ne.s32.totalorder %s31_s16, %s2097_s26  ;;  %p2103_p5 = scmp.lt.s32.totalorder %s2097_s26, %s2097_s26 }
   0xe   :  { %p2104_p6 = por %p2103_p5, %p2102_p4 }
  0x10   :  { %p2105_p7 = pnand %p2104_p6, %p2098_p3 }
  0x12   :  { %2108 = shalt.err (!%p2105_p7)
}
  0x13   :  { %s2207_s27 = smov 128   ;;  %s2208_s28 = smov 8  }
  0x14   :  { %36 = dma.hbm_to_vmem [thread:$0]  %s2593_s1, 2048, %s31_s16, [#allocation6], %s2207_s27, %s2207_s27, %s2208_s28  }
  0x15   :  { %s2109_s7 = scalar_lea.hbm %s2592_s0, 2048 }
  0x16   :  { %p2110_p8 = scmp.ne.s32.totalorder %s2592_s0, %s2109_s7  ;;  %p2113_p9 = scmp.lt.u32.totalorder %s2109_s7, %s2592_s0 }
  0x18   :  { %p2115_p10 = pnand %p2113_p9, %p2110_p8 }
  0x1a   :  { %2118 = shalt.err (!%p2115_p10)
}
  0x1b   :  { %s2119_s12 = scalar_lea.vmem %s2237_s18, 2048  ;;  %p2124_p12 = scmp.lt.s32.totalorder %s2237_s18, %s2237_s18 }
  0x1c   :  { %p2120_p11 = scmp.ne.s32.totalorder %s2237_s18, %s2119_s12  ;;  %p2125_p13 = scmp.lt.s32.totalorder %s2119_s12, %s2119_s12 }
  0x1e   :  { %p2126_p0 = por %p2125_p13, %p2124_p12 }
  0x20   :  { %p2127_p1 = pnand %p2126_p0, %p2120_p11 }
  0x22   :  { %2130 = shalt.err (!%p2127_p1)
}
  0x23   :  { %24 = dma.hbm_to_vmem [thread:$0]  %s2592_s0, 2048, %s2237_s18, [#allocation3], %s2207_s27, %s2207_s27, %s2208_s28  }
  0x24   :  { %s2209_s14 = smov [#allocation7]   ;;  %s2210_s16 = smov [#allocation8]  }
  0x25   :  { %s42_s15 = sshll.u32 %s2209_s14, 4  ;;  %s54_s17 = sshll.u32 %s2210_s16, 4  ;;  %s43_s15 = int_to_ptr.vmem [resolvable:$true] %s42_s15  ;;  %s2274_s17 = int_to_ptr.vmem [resolvable:$true] %s54_s17 }
  0x26   :  { %s2131_s21 = scalar_lea.hbm %s2594_s2, 2048 }
  0x27   :  { %p2132_p2 = scmp.ne.s32.totalorder %s2594_s2, %s2131_s21  ;;  %p2135_p3 = scmp.lt.u32.totalorder %s2131_s21, %s2594_s2 }
  0x29   :  { %p2137_p4 = pnand %p2135_p3, %p2132_p2 }
  0x2b   :  { %2140 = shalt.err (!%p2137_p4)
}
  0x2c   :  { %s2141_s0 = scalar_lea.vmem %s43_s15, 2048  ;;  %p2146_p6 = scmp.lt.s32.totalorder %s43_s15, %s43_s15 }
  0x2d   :  { %p2142_p5 = scmp.ne.s32.totalorder %s43_s15, %s2141_s0  ;;  %p2147_p7 = scmp.lt.s32.totalorder %s2141_s0, %s2141_s0 }
  0x2f   :  { %p2148_p8 = por %p2147_p7, %p2146_p6 }
  0x31   :  { %p2149_p9 = pnand %p2148_p8, %p2142_p5 }
  0x33   :  { %2152 = shalt.err (!%p2149_p9)
}
  0x34   :  { %48 = dma.hbm_to_vmem [thread:$0]  %s2594_s2, 2048, %s43_s15, [#allocation6], %s2207_s27, %s2207_s27, %s2208_s28  }
  0x35   :  { %s2153_s5 = scalar_lea.hbm %s2595_s3, 256 }
  0x36   :  { %p2154_p10 = scmp.ne.s32.totalorder %s2595_s3, %s2153_s5  ;;  %p2157_p11 = scmp.lt.u32.totalorder %s2153_s5, %s2595_s3 }
  0x38   :  { %p2159_p12 = pnand %p2157_p11, %p2154_p10 }
  0x3a   :  { %2162 = shalt.err (!%p2159_p12)
}
  0x3b   :  { %s2163_s10 = scalar_lea.vmem %s2274_s17, 256  ;;  %p2168_p0 = scmp.lt.s32.totalorder %s2274_s17, %s2274_s17 }
  0x3c   :  { %p2164_p13 = scmp.ne.s32.totalorder %s2274_s17, %s2163_s10  ;;  %p2169_p1 = scmp.lt.s32.totalorder %s2163_s10, %s2163_s10 }
  0x3e   :  { %p2170_p2 = por %p2169_p1, %p2168_p0 }
  0x40   :  { %p2171_p3 = pnand %p2170_p2, %p2164_p13 }
  0x42   :  { %2174 = shalt.err (!%p2171_p3)
}
  0x43   :  { %60 = dma.hbm_to_vmem [thread:$0]  %s2595_s3, 256, %s2274_s17, [#allocation9], %s2207_s27, %s2207_s27, %s2208_s28  }
  0x44   :  { %2197 = dma.done.wait [#allocation3], 2048  }
  0x45   :  { %2198 = vsyncadd [#allocation3], 4294965248 }
  0x46   :  { %2199 = dma.done.wait [#allocation6], 4096  }
  0x47   :  { %2200 = vsyncadd [#allocation6], 4294963200 }
  0x48   :  { %2201 = dma.done.wait [#allocation9], 256  }
  0x49   :  { %2202 = vsyncadd [#allocation9], 4294967040  ;;  %vm123_vm0 = vcmask 261120   ;;  %v89_v1 = vld [vmem:[#allocation5] sm:$0xff]  ;;  %v90_v2 = vld [vmem:[#allocation5 + $0x8] sm:$0xff]  ;;  %vm852_vm2 = vcmask 130048  }
  0x4a   :  { %vm2313_vm1 = vmpackc.low %vm123_vm0, %vm123_vm0  ;;  %v91_v3 = vld [vmem:[#allocation5 + $0x10] sm:$0xff]  ;;  %v1936_v4 = vpack.c.bf16 %v90_v2, %v89_v1  ;;  %v92_v5 = vld [vmem:[#allocation5 + $0x18] sm:$0xff]  ;;  %s2211_s3 = smov [#allocation10]  }
  0x4b   :  { %v73_v6 = vld [vmem:[#allocation2] sm:$0xff]  ;;  %v1942_v7 = vpack.c.bf16 %v92_v5, %v91_v3  ;;  %v75_v8 = vld [vmem:[#allocation2 + $0x10] sm:$0xff]  ;;  %v94_v10 = vld [vmem:[#allocation5 + $0x28] sm:$0xff]  ;;  %s1698_s12 = sshll.u32 %s2211_s3, 4  ;;  %s1699_s12 = int_to_ptr.vmem [resolvable:$true] %s1698_s12 }
  0x4c   :  { %1828 = vmatprep.mubr.msk.f32.mxu0 %vm123_vm0, %v73_v6  ;;  %v93_v9 = vld [vmem:[#allocation5 + $0x20] sm:$0xff]  ;;  %1938 = vmatprep.subr.msk.bf16.mxu0 %vm2313_vm1, %v1936_v4  ;;  %v95_v12 = vld [vmem:[#allocation5 + $0x30] sm:$0xff]  ;;  %v96_v13 = vld [vmem:[#allocation5 + $0x38] sm:$0xff]  ;;  %s2175_s1 = scalar_lea.vmem %s1699_s12, 2048  ;;  %p2180_p5 = scmp.lt.s32.totalorder %s1699_s12, %s1699_s12 }
  0x4d   :  { %1835 = vmatprep.mubr.msk.f32.mxu1 %vm123_vm0, %v75_v8  ;;  %v1948_v11 = vpack.c.bf16 %v94_v10, %v93_v9  ;;  %1944 = vmatprep.subr.msk.bf16.mxu1 %vm2313_vm1, %v1942_v7  ;;  %v1954_v14 = vpack.c.bf16 %v96_v13, %v95_v12  ;;  %v97_v15 = vld [vmem:[#allocation5 + $0x40] sm:$0xff]  ;;  %v98_v16 = vld [vmem:[#allocation5 + $0x48] sm:$0xff]  ;;  %v99_v18 = vld [vmem:[#allocation5 + $0x50] sm:$0xff]  ;;  %p2176_p4 = scmp.ne.s32.totalorder %s1699_s12, %s2175_s1  ;;  %p2181_p6 = scmp.lt.s32.totalorder %s2175_s1, %s2175_s1 }
  0x4e   :  { %1941 = vmatpush3.bf16.xpose.msk.msra.mxu0 %vm2313_vm1, %v1936_v4  ;;  %1947 = vmatpush3.bf16.xpose.msk.msra.mxu1 %vm2313_vm1, %v1942_v7  ;;  %v74_v17 = vld [vmem:[#allocation2 + $0x8] sm:$0xff]  ;;  %v100_v19 = vld [vmem:[#allocation5 + $0x58] sm:$0xff]  ;;  %v79_v21 = vld [vmem:[#allocation2 + $0x30] sm:$0xff]  ;;  %v1960_v22 = vpack.c.bf16 %v98_v16, %v97_v15 }
  0x4f   :  { %1950 = vmatprep.subr.msk.bf16.mxu0 %vm2313_vm1, %v1948_v11  ;;  %1956 = vmatprep.subr.msk.bf16.mxu1 %vm2313_vm1, %v1954_v14  ;;  %v76_v20 = vld [vmem:[#allocation2 + $0x18] sm:$0xff]  ;;  %v77_v23 = vld [vmem:[#allocation2 + $0x20] sm:$0xff]  ;;  %v1966_v24 = vpack.c.bf16 %v100_v19, %v99_v18  ;;  %v102_v26 = vld [vmem:[#allocation5 + $0x68] sm:$0xff]  ;;  %p2182_p7 = por %p2181_p6, %p2180_p5 }
  0x50   :  { %v101_v25 = vld [vmem:[#allocation5 + $0x60] sm:$0xff]  ;;  %v78_v27 = vld [vmem:[#allocation2 + $0x28] sm:$0xff]  ;;  %v103_v28 = vld [vmem:[#allocation5 + $0x70] sm:$0xff] }
  0x51   :  { %v104_v29 = vld [vmem:[#allocation5 + $0x78] sm:$0xff]  ;;  %v83_v31 = vld [vmem:[#allocation2 + $0x50] sm:$0xff]  ;;  %v1972_v32 = vpack.c.bf16 %v102_v26, %v101_v25  ;;  %v81_v33 = vld [vmem:[#allocation2 + $0x40] sm:$0xff]  ;;  %p2183_p8 = pnand %p2182_p7, %p2176_p4 }
  0x52   :  { %v80_v30 = vld [vmem:[#allocation2 + $0x38] sm:$0xff]  ;;  %v1978_v34 = vpack.c.bf16 %v104_v29, %v103_v28  ;;  %v82_v35 = vld [vmem:[#allocation2 + $0x48] sm:$0xff]  ;;  %v85_v37 = vld [vmem:[#allocation2 + $0x60] sm:$0xff] }
  0x53   :  { %v84_v36 = vld [vmem:[#allocation2 + $0x58] sm:$0xff]  ;;  %v87_v38 = vld [vmem:[#allocation2 + $0x70] sm:$0xff]  ;;  %v86_v39 = vld [vmem:[#allocation2 + $0x68] sm:$0xff] }
  0x54   :  { %v88_v40 = vld [vmem:[#allocation2 + $0x78] sm:$0xff]  ;;  %v2365_v42 = vld [vmem:[#allocation8 + $0x8] sm:$0xff]  ;;  %v2367_v46 = vld [vmem:[#allocation8] sm:$0xff] }
  0x55   :  { %1829 = vmatmul.mubr.msk.f32.vlgmr.msra.gmra.mrb[0].mxu0 %vm123_vm0, %v74_v17  ;;  %1836 = vmatmul.mubr.msk.f32.vlgmr.msra.gmra.mrb[0].mxu1 %vm123_vm0, %v76_v20 }
  0x56   :  { %1953 = vmatpush3.bf16.xpose.msk.msra.mxu0 %vm2313_vm1, %v1948_v11  ;;  %1959 = vmatpush3.bf16.xpose.msk.msra.mxu1 %vm2313_vm1, %v1954_v14 }
  0x57   :  { %1849 = vmatprep.mubr.msk.f32.mxu1 %vm123_vm0, %v79_v21  ;;  %1842 = vmatprep.mubr.msk.f32.mxu0 %vm123_vm0, %v77_v23 }
  0x58   :  { %1962 = vmatprep.subr.msk.bf16.mxu0 %vm2313_vm1, %v1960_v22  ;;  %1968 = vmatprep.subr.msk.bf16.mxu1 %vm2313_vm1, %v1966_v24 }
  0x5d   :  { %1843 = vmatmul.mubr.msk.f32.vlgmr.msra.gmra.mrb[2].mxu0 %vm123_vm0, %v78_v27  ;;  %1850 = vmatmul.mubr.msk.f32.vlgmr.msra.gmra.mrb[2].mxu1 %vm123_vm0, %v80_v30 }
  0x5e   :  { %1965 = vmatpush3.bf16.xpose.msk.msra.mxu0 %vm2313_vm1, %v1960_v22  ;;  %1971 = vmatpush3.bf16.xpose.msk.msra.mxu1 %vm2313_vm1, %v1966_v24 }
  0x5f   :  { %1863 = vmatprep.mubr.msk.f32.mxu1 %vm123_vm0, %v83_v31  ;;  %1856 = vmatprep.mubr.msk.f32.mxu0 %vm123_vm0, %v81_v33 }
  0x60   :  { %1974 = vmatprep.subr.msk.bf16.mxu0 %vm2313_vm1, %v1972_v32  ;;  %1980 = vmatprep.subr.msk.bf16.mxu1 %vm2313_vm1, %v1978_v34 }
  0x65   :  { %1857 = vmatmul.mubr.msk.f32.vlgmr.msra.gmra.mrb[4].mxu0 %vm123_vm0, %v82_v35  ;;  %1864 = vmatmul.mubr.msk.f32.vlgmr.msra.gmra.mrb[4].mxu1 %vm123_vm0, %v84_v36 }
  0x66   :  { %1977 = vmatpush3.bf16.xpose.msk.msra.mxu0 %vm2313_vm1, %v1972_v32  ;;  %1983 = vmatpush3.bf16.xpose.msk.msra.mxu1 %vm2313_vm1, %v1978_v34 }
  0x67   :  { %1870 = vmatprep.mubr.msk.f32.mxu0 %vm123_vm0, %v85_v37  ;;  %1877 = vmatprep.mubr.msk.f32.mxu1 %vm123_vm0, %v87_v38 }
  0x6d   :  { %1871 = vmatmul.mubr.msk.f32.vlgmr.msra.gmra.mrb[6].mxu0 %vm123_vm0, %v86_v39  ;;  %1878 = vmatmul.mubr.msk.f32.vlgmr.msra.gmra.mrb[6].mxu1 %vm123_vm0, %v88_v40 }
 0x128   :  { %v1830_v41 = vpop.f32.mrb[0].mxu0  ;;  %v1837_v45 = vpop.f32.mrb[0].mxu1 }
 0x129   :  { %v821_v43 = vmul.f32 0.17677669, %v1830_v41  ;;  %v202_v44 = vpop.f32.mrb[1].mxu0  ;;  %v823_v48 = vmul.f32 0.17677669, %v1837_v45  ;;  %v289_v49 = vpop.f32.mrb[1].mxu1 }
 0x12a   :  { %v820_v47 = vmul.f32 0.17677669, %v202_v44  ;;  %v822_v50 = vmul.f32 0.17677669, %v289_v49 }
 0x12b   :  { %v2370_v51 = vadd.f32 %v821_v43, %v2365_v42  ;;  %v2376_v53 = vadd.f32 %v823_v48, %v2365_v42 }
 0x12c   :  { %v2373_v52 = vadd.f32 %v820_v47, %v2367_v46  ;;  %v2381_v55 = vadd.f32 %v822_v50, %v2367_v46 }
 0x12d   :  { %v856_v54 = vsel %vm852_vm2, %v2370_v51, -inf  ;;  %v862_v57 = vsel %vm852_vm2, %v2376_v53, -inf }
 0x12e   :  { %857 = vmax.xlane.f32.xlu1 %v856_v54  ;;  %v853_v56 = vsel %vm852_vm2, %v2373_v52, -inf  ;;  %v859_v59 = vsel %vm852_vm2, %v2381_v55, -inf }
 0x12f   :  { %854 = vmax.xlane.f32.xlu0 %v853_v56 }
 0x130   :  { %v1844_v58 = vpop.f32.mrb[2].mxu0  ;;  %v1851_v60 = vpop.f32.mrb[2].mxu1 }
 0x131   :  { %v825_v61 = vmul.f32 0.17677669, %v1844_v58  ;;  %v376_v62 = vpop.f32.mrb[3].mxu0  ;;  %v827_v63 = vmul.f32 0.17677669, %v1851_v60  ;;  %v463_v1 = vpop.f32.mrb[3].mxu1 }
 0x132   :  { %863 = vmax.xlane.f32.xlu1 %v862_v57  ;;  %v824_v0 = vmul.f32 0.17677669, %v376_v62  ;;  %v826_v2 = vmul.f32 0.17677669, %v463_v1 }
 0x133   :  { %860 = vmax.xlane.f32.xlu0 %v859_v59  ;;  %v2390_v3 = vadd.f32 %v825_v61, %v2365_v42  ;;  %v2393_v4 = vadd.f32 %v827_v63, %v2365_v42 }
 0x134   :  { %v2396_v5 = vadd.f32 %v824_v0, %v2367_v46  ;;  %v2401_v7 = vadd.f32 %v826_v2, %v2367_v46 }
 0x135   :  { %v868_v6 = vsel %vm852_vm2, %v2390_v3, -inf  ;;  %v874_v8 = vsel %vm852_vm2, %v2393_v4, -inf }
 0x136   :  { %875 = vmax.xlane.f32.xlu1 %v874_v8  ;;  %v871_v10 = vsel %vm852_vm2, %v2401_v7, -inf  ;;  %v865_v11 = vsel %vm852_vm2, %v2396_v5, -inf }
 0x137   :  { %869 = vmax.xlane.f32.xlu0 %v868_v6 }
 0x138   :  { %v1858_v9 = vpop.f32.mrb[4].mxu0  ;;  %v1865_v12 = vpop.f32.mrb[4].mxu1 }
 0x139   :  { %v829_v13 = vmul.f32 0.17677669, %v1858_v9  ;;  %v550_v14 = vpop.f32.mrb[5].mxu0  ;;  %v831_v15 = vmul.f32 0.17677669, %v1865_v12  ;;  %v637_v17 = vpop.f32.mrb[5].mxu1 }
 0x13a   :  { %v828_v16 = vmul.f32 0.17677669, %v550_v14  ;;  %872 = vmax.xlane.f32.xlu1 %v871_v10  ;;  %v830_v18 = vmul.f32 0.17677669, %v637_v17 }
 0x13b   :  { %866 = vmax.xlane.f32.xlu0 %v865_v11  ;;  %v2410_v19 = vadd.f32 %v829_v13, %v2365_v42  ;;  %v2413_v20 = vadd.f32 %v831_v15, %v2365_v42 }
 0x13c   :  { %v2416_v21 = vadd.f32 %v828_v16, %v2367_v46  ;;  %v2421_v23 = vadd.f32 %v830_v18, %v2367_v46 }
 0x13d   :  { %v880_v22 = vsel %vm852_vm2, %v2410_v19, -inf  ;;  %v886_v24 = vsel %vm852_vm2, %v2413_v20, -inf }
 0x13e   :  { %887 = vmax.xlane.f32.xlu1 %v886_v24  ;;  %v883_v26 = vsel %vm852_vm2, %v2421_v23, -inf  ;;  %v877_v27 = vsel %vm852_vm2, %v2416_v21, -inf }
 0x13f   :  { %881 = vmax.xlane.f32.xlu0 %v880_v22 }
 0x140   :  { %v1872_v25 = vpop.f32.mrb[6].mxu0  ;;  %v1879_v28 = vpop.f32.mrb[6].mxu1 }
 0x141   :  { %v724_v29 = vpop.f32.mrb[7].mxu0  ;;  %v833_v30 = vmul.f32 0.17677669, %v1872_v25  ;;  %v811_v32 = vpop.f32.mrb[7].mxu1  ;;  %v835_v33 = vmul.f32 0.17677669, %v1879_v28 }
 0x142   :  { %v832_v31 = vmul.f32 0.17677669, %v724_v29  ;;  %v834_v34 = vmul.f32 0.17677669, %v811_v32  ;;  %884 = vmax.xlane.f32.xlu1 %v883_v26 }
 0x143   :  { %878 = vmax.xlane.f32.xlu0 %v877_v27  ;;  %v2438_v38 = vadd.f32 %v833_v30, %v2365_v42  ;;  %v2443_v40 = vadd.f32 %v835_v33, %v2365_v42 }
 0x144   :  { %v2430_v35 = vadd.f32 %v832_v31, %v2367_v46  ;;  %v2433_v36 = vadd.f32 %v834_v34, %v2367_v46 }
 0x145   :  { %v892_v41 = vsel %vm852_vm2, %v2438_v38, -inf  ;;  %v898_v43 = vsel %vm852_vm2, %v2443_v40, -inf }
 0x146   :  { %v889_v37 = vsel %vm852_vm2, %v2430_v35, -inf  ;;  %v895_v39 = vsel %vm852_vm2, %v2433_v36, -inf }
 0x147   :  { %890 = vmax.xlane.f32.xlu0 %v889_v37  ;;  %896 = vmax.xlane.f32.xlu1 %v895_v39 }
 0x14b   :  { %893 = vmax.xlane.f32.xlu0 %v892_v41  ;;  %899 = vmax.xlane.f32.xlu1 %v898_v43 }
 0x1bb   :  { %v858_v44 = vpop.xlane.xlu1 %857 }
 0x1bc   :  { %v902_v45 = vsub.f32 %v2370_v51, %v858_v44  ;;  %v855_v46 = vpop.xlane.xlu0 %854 }
 0x1bd   :  { %v901_v47 = vsub.f32 %v2373_v52, %v855_v46 }
 0x1be   :  { %v919_v48 = vmul.f32 1.442695, %v902_v45 }
 0x1bf   :  { %v917_v49 = vmul.f32 1.442695, %v901_v47  ;;  %v864_v50 = vpop.xlane.xlu1 %863 }
 0x1c0   :  { %2023 = vpow2.f32 %v919_v48  ;;  %v904_v42 = vsub.f32 %v2376_v53, %v864_v50  ;;  %v861_v54 = vpop.xlane.xlu0 %860 }
 0x1c1   :  { %v903_v56 = vsub.f32 %v2381_v55, %v861_v54  ;;  %2025 = vpow2.f32 %v917_v49 }
 0x1c2   :  { %v923_v57 = vmul.f32 1.442695, %v904_v42 }
 0x1c3   :  { %v921_v58 = vmul.f32 1.442695, %v903_v56  ;;  %v876_v59 = vpop.xlane.xlu1 %875 }
 0x1c4   :  { %2027 = vpow2.f32 %v923_v57  ;;  %v870_v60 = vpop.xlane.xlu0 %869  ;;  %v908_v51 = vsub.f32 %v2393_v4, %v876_v59  ;;  %v106_v59 = vld [vmem:[#allocation7 + $0x8] sm:$0xff] }
 0x1c5   :  { %v906_v61 = vsub.f32 %v2390_v3, %v870_v60  ;;  %2029 = vpow2.f32 %v921_v58  ;;  %v105_v58 = vld [vmem:[#allocation7] sm:$0xff] }
 0x1c6   :  { %v931_v52 = vmul.f32 1.442695, %v908_v51 }
 0x1c7   :  { %v927_v62 = vmul.f32 1.442695, %v906_v61  ;;  %v873_v63 = vpop.xlane.xlu1 %872  ;;  %v1984_v61 = vpack.c.bf16 %v106_v59, %v105_v58 }
 0x1c8   :  { %v867_v0 = vpop.xlane.xlu0 %866  ;;  %2031 = vpow2.f32 %v931_v52  ;;  %v907_v53 = vsub.f32 %v2401_v7, %v873_v63  ;;  %v107_v63 = vld [vmem:[#allocation7 + $0x10] sm:$0xff] }
 0x1c9   :  { %v905_v55 = vsub.f32 %v2396_v5, %v867_v0  ;;  %2033 = vpow2.f32 %v927_v62  ;;  %1985 = vmatprep.subr.bf16.mxu0 %v1984_v61  ;;  %v108_v0 = vld [vmem:[#allocation7 + $0x18] sm:$0xff] }
 0x1ca   :  { %v2457_v1 = vpop.eup %2023  ;;  %v929_v2 = vmul.f32 1.442695, %v907_v53  ;;  %1987 = vmatpush3.bf16.msra.mxu0 %v1984_v61 }
 0x1cb   :  { %v925_v6 = vmul.f32 1.442695, %v905_v55  ;;  %v952_v4 = vsel %vm852_vm2, %v2457_v1, 0.0  ;;  %v2461_v8 = vpop.eup %2025  ;;  %v888_v3 = vpop.xlane.xlu1 %887  ;;  %v1988_v55 = vpack.c.bf16 %v108_v0, %v107_v63 }
 0x1cc   :  { %v882_v9 = vpop.xlane.xlu0 %881  ;;  %953 = vadd.xlane.f32.xlu0 %v952_v4  ;;  %2035 = vpow2.f32 %v929_v2  ;;  %v912_v10 = vsub.f32 %v2413_v20, %v888_v3  ;;  %v949_v14 = vsel %vm852_vm2, %v2461_v8, 0.0  ;;  %v109_v2 = vld [vmem:[#allocation7 + $0x20] sm:$0xff]  ;;  %v111_v3 = vld [vmem:[#allocation7 + $0x30] sm:$0xff] }
 0x1cd   :  { %v910_v7 = vsub.f32 %v2410_v19, %v882_v9  ;;  %2037 = vpow2.f32 %v925_v6  ;;  %1989 = vmatprep.subr.bf16.mxu1 %v1988_v55  ;;  %v110_v6 = vld [vmem:[#allocation7 + $0x28] sm:$0xff]  ;;  %v112_v9 = vld [vmem:[#allocation7 + $0x38] sm:$0xff] }
 0x1ce   :  { %v2465_v11 = vpop.eup %2027  ;;  %v939_v5 = vmul.f32 1.442695, %v912_v10  ;;  %1991 = vmatpush3.bf16.msra.mxu1 %v1988_v55  ;;  %v1992_v4 = vpack.c.bf16 %v110_v6, %v109_v2  ;;  %v1996_v10 = vpack.c.bf16 %v112_v9, %v111_v3 }
 0x1cf   :  { %v935_v12 = vmul.f32 1.442695, %v910_v7  ;;  %v958_v13 = vsel %vm852_vm2, %v2465_v11, 0.0  ;;  %v2471_v15 = vpop.eup %2029  ;;  %v885_v16 = vpop.xlane.xlu1 %884 }
 0x1d0   :  { %959 = vadd.xlane.f32.xlu1 %v958_v13  ;;  %v879_v17 = vpop.xlane.xlu0 %878  ;;  %950 = vadd.xlane.f32.xlu0 %v949_v14  ;;  %2039 = vpow2.f32 %v939_v5  ;;  %v911_v18 = vsub.f32 %v2421_v23, %v885_v16  ;;  %v955_v25 = vsel %vm852_vm2, %v2471_v15, 0.0 }
 0x1d1   :  { %v909_v19 = vsub.f32 %v2416_v21, %v879_v17  ;;  %2041 = vpow2.f32 %v935_v12  ;;  %1993 = vmatprep.subr.bf16.mxu0 %v1992_v4  ;;  %1997 = vmatprep.subr.bf16.mxu1 %v1996_v10 }
 0x1d2   :  { %v2475_v20 = vpop.eup %2031  ;;  %v937_v22 = vmul.f32 1.442695, %v911_v18 }
 0x1d3   :  { %v933_v24 = vmul.f32 1.442695, %v909_v19  ;;  %v2479_v26 = vpop.eup %2033  ;;  %v970_v32 = vsel %vm852_vm2, %v2475_v20, 0.0  ;;  %v113_v19 = vld [vmem:[#allocation7 + $0x40] sm:$0xff] }
 0x1d4   :  { %956 = vadd.xlane.f32.xlu1 %v955_v25  ;;  %v891_v27 = vpop.xlane.xlu0 %890  ;;  %2043 = vpow2.f32 %v937_v22  ;;  %v897_v28 = vpop.xlane.xlu1 %896  ;;  %v964_v23 = vsel %vm852_vm2, %v2479_v26, 0.0  ;;  %v114_v22 = vld [vmem:[#allocation7 + $0x48] sm:$0xff] }
 0x1d5   :  { %v913_v29 = vsub.f32 %v2430_v35, %v891_v27  ;;  %2045 = vpow2.f32 %v933_v24  ;;  %v915_v21 = vsub.f32 %v2433_v36, %v897_v28  ;;  %965 = vadd.xlane.f32.xlu0 %v964_v23 }
 0x1d6   :  { %v2485_v30 = vpop.eup %2035 }
 0x1d7   :  { %v941_v31 = vmul.f32 1.442695, %v913_v29  ;;  %v2489_v33 = vpop.eup %2037  ;;  %v945_v34 = vmul.f32 1.442695, %v915_v21  ;;  %v967_v45 = vsel %vm852_vm2, %v2485_v30, 0.0  ;;  %v2000_v21 = vpack.c.bf16 %v114_v22, %v113_v19 }
 0x1d8   :  { %971 = vadd.xlane.f32.xlu1 %v970_v32  ;;  %v894_v37 = vpop.xlane.xlu0 %893  ;;  %v900_v35 = vpop.xlane.xlu1 %899  ;;  %v961_v41 = vsel %vm852_vm2, %v2489_v33, 0.0  ;;  %v116_v32 = vld [vmem:[#allocation7 + $0x58] sm:$0xff] }
 0x1d9   :  { %2047 = vpow2.f32 %v941_v31  ;;  %v914_v39 = vsub.f32 %v2438_v38, %v894_v37  ;;  %v916_v36 = vsub.f32 %v2443_v40, %v900_v35  ;;  %962 = vadd.xlane.f32.xlu0 %v961_v41  ;;  %v115_v31 = vld [vmem:[#allocation7 + $0x50] sm:$0xff] }
 0x1da   :  { %2049 = vpow2.f32 %v945_v34  ;;  %v2495_v43 = vpop.eup %2039  ;;  %v2004_v41 = vpack.c.bf16 %v116_v32, %v115_v31 }
 0x1db   :  { %v943_v44 = vmul.f32 1.442695, %v914_v39  ;;  %v2499_v46 = vpop.eup %2041  ;;  %v947_v47 = vmul.f32 1.442695, %v916_v36  ;;  %v982_v40 = vsel %vm852_vm2, %v2495_v43, 0.0 }
 0x1dc   :  { %968 = vadd.xlane.f32.xlu1 %v967_v45  ;;  %v976_v38 = vsel %vm852_vm2, %v2499_v46, 0.0  ;;  %v118_v45 = vld [vmem:[#allocation7 + $0x68] sm:$0xff] }
 0x1dd   :  { %2051 = vpow2.f32 %v943_v44  ;;  %977 = vadd.xlane.f32.xlu0 %v976_v38  ;;  %v117_v44 = vld [vmem:[#allocation7 + $0x60] sm:$0xff] }
 0x1de   :  { %2053 = vpow2.f32 %v947_v47  ;;  %v2503_v48 = vpop.eup %2043  ;;  %v2008_v58 = vpack.c.bf16 %v118_v45, %v117_v44 }
 0x1df   :  { %v2507_v49 = vpop.eup %2045  ;;  %v979_v54 = vsel %vm852_vm2, %v2503_v48, 0.0 }
 0x1e0   :  { %983 = vadd.xlane.f32.xlu1 %v982_v40  ;;  %v973_v50 = vsel %vm852_vm2, %v2507_v49, 0.0  ;;  %v119_v40 = vld [vmem:[#allocation7 + $0x70] sm:$0xff] }
 0x1e1   :  { %974 = vadd.xlane.f32.xlu0 %v973_v50  ;;  %v120_v50 = vld [vmem:[#allocation7 + $0x78] sm:$0xff] }
 0x1e3   :  { %v2511_v42 = vpop.eup %2047 }
 0x1e4   :  { %v2515_v56 = vpop.eup %2049  ;;  %980 = vadd.xlane.f32.xlu1 %v979_v54  ;;  %v985_v57 = vsel %vm852_vm2, %v2511_v42, 0.0 }
 0x1e5   :  { %986 = vadd.xlane.f32.xlu0 %v985_v57  ;;  %v991_v51 = vsel %vm852_vm2, %v2515_v56, 0.0 }
 0x1e7   :  { %v2519_v60 = vpop.eup %2051 }
 0x1e8   :  { %v2523_v52 = vpop.eup %2053  ;;  %992 = vadd.xlane.f32.xlu1 %v991_v51  ;;  %v988_v62 = vsel %vm852_vm2, %v2519_v60, 0.0 }
 0x1e9   :  { %989 = vadd.xlane.f32.xlu0 %v988_v62  ;;  %v994_v53 = vsel %vm852_vm2, %v2523_v52, 0.0  ;;  %v2012_v62 = vpack.c.bf16 %v120_v50, %v119_v40 }
 0x1ec   :  { %995 = vadd.xlane.f32.xlu1 %v994_v53 }
 0x259   :  { %v954_v7 = vpop.xlane.xlu0 %953 }
 0x25a   :  { %2055 = vrcp.f32 %v954_v7 }
 0x25d   :  { %v960_v5 = vpop.xlane.xlu1 %959  ;;  %v951_v12 = vpop.xlane.xlu0 %950 }
 0x25e   :  { %2057 = vrcp.f32 %v951_v12 }
 0x25f   :  { %2059 = vrcp.f32 %v960_v5 }
 0x261   :  { %v957_v13 = vpop.xlane.xlu1 %956 }
 0x262   :  { %2061 = vrcp.f32 %v957_v13  ;;  %v966_v14 = vpop.xlane.xlu0 %965 }
 0x263   :  { %2063 = vrcp.f32 %v966_v14 }
 0x264   :  { %v2056_v18 = vpop.eup %2055 }
 0x265   :  { %v972_v16 = vpop.xlane.xlu1 %971  ;;  %v1014_v29 = vmul.f32 %v2056_v18, %v2457_v1 }
 0x266   :  { %v963_v17 = vpop.xlane.xlu0 %962 }
 0x267   :  { %2065 = vrcp.f32 %v963_v17 }
 0x268   :  { %v2058_v24 = vpop.eup %2057  ;;  %2067 = vrcp.f32 %v972_v16 }
 0x269   :  { %v969_v25 = vpop.xlane.xlu1 %968  ;;  %v1013_v27 = vmul.f32 %v2058_v24, %v2461_v8  ;;  %v2060_v28 = vpop.eup %2059 }
 0x26a   :  { %2069 = vrcp.f32 %v969_v25  ;;  %v978_v23 = vpop.xlane.xlu0 %977  ;;  %v1016_v39 = vmul.f32 %v2060_v28, %v2465_v11 }
 0x26b   :  { %1884 = vmatprep.mubr.msk.f32.mxu0 %vm852_vm2, %v1013_v27  ;;  %2071 = vrcp.f32 %v978_v23 }
 0x26c   :  { %v2062_v34 = vpop.eup %2061  ;;  %1885 = vmatmul.mubr.msk.f32.vlgmr.msra.gmra.mrb[8].mxu0 %vm852_vm2, %v1014_v29 }
 0x26d   :  { %v984_v37 = vpop.xlane.xlu1 %983  ;;  %v1015_v35 = vmul.f32 %v2062_v34, %v2471_v15  ;;  %1995 = vmatpush3.bf16.msra.mxu0 %v1992_v4  ;;  %v2064_v1 = vpop.eup %2063 }
 0x26e   :  { %v975_v8 = vpop.xlane.xlu0 %974  ;;  %2001 = vmatprep.subr.bf16.mxu0 %v2000_v21  ;;  %v1018_v57 = vmul.f32 %v2064_v1, %v2479_v26 }
 0x26f   :  { %1891 = vmatprep.mubr.msk.f32.mxu1 %vm852_vm2, %v1015_v35  ;;  %2073 = vrcp.f32 %v975_v8 }
 0x270   :  { %1892 = vmatmul.mubr.msk.f32.vlgmr.msra.gmra.mrb[8].mxu1 %vm852_vm2, %v1016_v39  ;;  %2075 = vrcp.f32 %v984_v37 }
 0x271   :  { %v981_v36 = vpop.xlane.xlu1 %980  ;;  %1999 = vmatpush3.bf16.msra.mxu1 %v1996_v10  ;;  %v2066_v47 = vpop.eup %2065 }
 0x272   :  { %2077 = vrcp.f32 %v981_v36  ;;  %2005 = vmatprep.subr.bf16.mxu1 %v2004_v41  ;;  %v2068_v11 = vpop.eup %2067  ;;  %v987_v15 = vpop.xlane.xlu0 %986  ;;  %v1017_v38 = vmul.f32 %v2066_v47, %v2489_v33 }
 0x273   :  { %2079 = vrcp.f32 %v987_v15  ;;  %v1020_v61 = vmul.f32 %v2068_v11, %v2475_v20 }
 0x274   :  { %v2070_v54 = vpop.eup %2069  ;;  %1898 = vmatprep.mubr.msk.f32.mxu0 %vm852_vm2, %v1017_v38 }
 0x275   :  { %v993_v59 = vpop.xlane.xlu1 %992  ;;  %v1019_v51 = vmul.f32 %v2070_v54, %v2485_v30  ;;  %1899 = vmatmul.mubr.msk.f32.vlgmr.msra.gmra.mrb[10].mxu0 %vm852_vm2, %v1018_v57  ;;  %v2072_v26 = vpop.eup %2071 }
 0x276   :  { %2081 = vrcp.f32 %v993_v59  ;;  %v990_v63 = vpop.xlane.xlu0 %989  ;;  %2003 = vmatpush3.bf16.msra.mxu0 %v2000_v21  ;;  %v1022_v55 = vmul.f32 %v2072_v26, %v2499_v46 }
 0x277   :  { %1905 = vmatprep.mubr.msk.f32.mxu1 %vm852_vm2, %v1019_v51  ;;  %2083 = vrcp.f32 %v990_v63  ;;  %2009 = vmatprep.subr.bf16.mxu0 %v2008_v58 }
 0x278   :  { %1906 = vmatmul.mubr.msk.f32.vlgmr.msra.gmra.mrb[10].mxu1 %vm852_vm2, %v1020_v61 }
 0x279   :  { %v996_v33 = vpop.xlane.xlu1 %995  ;;  %2007 = vmatpush3.bf16.msra.mxu1 %v2004_v41  ;;  %v2074_v0 = vpop.eup %2073 }
 0x27a   :  { %2085 = vrcp.f32 %v996_v33  ;;  %2013 = vmatprep.subr.bf16.mxu1 %v2012_v62  ;;  %v2076_v30 = vpop.eup %2075  ;;  %v1021_v20 = vmul.f32 %v2074_v0, %v2507_v49 }
 0x27b   :  { %v1024_v4 = vmul.f32 %v2076_v30, %v2495_v43 }
 0x27c   :  { %v2078_v53 = vpop.eup %2077  ;;  %1912 = vmatprep.mubr.msk.f32.mxu0 %vm852_vm2, %v1021_v20 }
 0x27d   :  { %v1023_v2 = vmul.f32 %v2078_v53, %v2503_v48  ;;  %v2080_v6 = vpop.eup %2079  ;;  %1913 = vmatmul.mubr.msk.f32.vlgmr.msra.gmra.mrb[12].mxu0 %vm852_vm2, %v1022_v55 }
 0x27e   :  { %v1025_v3 = vmul.f32 %v2080_v6, %v2511_v42  ;;  %2011 = vmatpush3.bf16.msra.mxu0 %v2008_v58 }
 0x27f   :  { %1919 = vmatprep.mubr.msk.f32.mxu1 %vm852_vm2, %v1023_v2 }
 0x280   :  { %v2082_v9 = vpop.eup %2081  ;;  %1920 = vmatmul.mubr.msk.f32.vlgmr.msra.gmra.mrb[12].mxu1 %vm852_vm2, %v1024_v4  ;;  %1926 = vmatprep.mubr.msk.f32.mxu0 %vm852_vm2, %v1025_v3 }
 0x281   :  { %2015 = vmatpush3.bf16.msra.mxu1 %v2012_v62  ;;  %v1027_v46 = vmul.f32 %v2082_v9, %v2515_v56  ;;  %v2084_v49 = vpop.eup %2083 }
 0x282   :  { %v1026_v48 = vmul.f32 %v2084_v49, %v2519_v60 }
 0x283   :  { %1933 = vmatprep.mubr.msk.f32.mxu1 %vm852_vm2, %v1027_v46 }
 0x284   :  { %v2086_v43 = vpop.eup %2085  ;;  %1927 = vmatmul.mubr.msk.f32.vlgmr.msra.gmra.mrb[14].mxu0 %vm852_vm2, %v1026_v48 }
 0x285   :  { %v1028_v10 = vmul.f32 %v2086_v43, %v2523_v52 }
 0x287   :  { %1934 = vmatmul.mubr.msk.f32.vlgmr.msra.gmra.mrb[14].mxu1 %vm852_vm2, %v1028_v10 }
 0x33f   :  { %v1886_v42 = vpop.f32.mrb[8].mxu0 }
 0x340   :  { %1678 = vst.msk [vmem:[#allocation10 + $0x8] sm:$0xff] %vm123_vm0, %v1886_v42  ;;  %v1101_v7 = vpop.f32.mrb[9].mxu0 }
 0x341   :  { %1677 = vst.msk [vmem:[#allocation10] sm:$0xff] %vm123_vm0, %v1101_v7 }
 0x343   :  { %v1893_v5 = vpop.f32.mrb[8].mxu1 }
 0x344   :  { %1680 = vst.msk [vmem:[#allocation10 + $0x18] sm:$0xff] %vm123_vm0, %v1893_v5  ;;  %v1182_v56 = vpop.f32.mrb[9].mxu1 }
 0x345   :  { %1679 = vst.msk [vmem:[#allocation10 + $0x10] sm:$0xff] %vm123_vm0, %v1182_v56 }
 0x348   :  { %v1900_v60 = vpop.f32.mrb[10].mxu0 }
 0x349   :  { %1682 = vst.msk [vmem:[#allocation10 + $0x28] sm:$0xff] %vm123_vm0, %v1900_v60  ;;  %v1263_v52 = vpop.f32.mrb[11].mxu0 }
 0x34a   :  { %1681 = vst.msk [vmem:[#allocation10 + $0x20] sm:$0xff] %vm123_vm0, %v1263_v52 }
 0x34b   :  { %v1907_v12 = vpop.f32.mrb[10].mxu1 }
 0x34c   :  { %1684 = vst.msk [vmem:[#allocation10 + $0x38] sm:$0xff] %vm123_vm0, %v1907_v12  ;;  %v1344_v13 = vpop.f32.mrb[11].mxu1 }
 0x34d   :  { %1683 = vst.msk [vmem:[#allocation10 + $0x30] sm:$0xff] %vm123_vm0, %v1344_v13 }
 0x350   :  { %v1914_v14 = vpop.f32.mrb[12].mxu0 }
 0x351   :  { %1686 = vst.msk [vmem:[#allocation10 + $0x48] sm:$0xff] %vm123_vm0, %v1914_v14  ;;  %v1425_v16 = vpop.f32.mrb[13].mxu0 }
 0x352   :  { %1685 = vst.msk [vmem:[#allocation10 + $0x40] sm:$0xff] %vm123_vm0, %v1425_v16 }
 0x353   :  { %v1921_v17 = vpop.f32.mrb[12].mxu1 }
 0x354   :  { %1688 = vst.msk [vmem:[#allocation10 + $0x58] sm:$0xff] %vm123_vm0, %v1921_v17  ;;  %v1506_v18 = vpop.f32.mrb[13].mxu1 }
 0x355   :  { %1687 = vst.msk [vmem:[#allocation10 + $0x50] sm:$0xff] %vm123_vm0, %v1506_v18 }
 0x357   :  { %v1928_v19 = vpop.f32.mrb[14].mxu0 }
 0x358   :  { %1690 = vst.msk [vmem:[#allocation10 + $0x68] sm:$0xff] %vm123_vm0, %v1928_v19  ;;  %v1587_v22 = vpop.f32.mrb[15].mxu0 }
 0x359   :  { %1689 = vst.msk [vmem:[#allocation10 + $0x60] sm:$0xff] %vm123_vm0, %v1587_v22 }
 0x35a   :  { %v1935_v24 = vpop.f32.mrb[14].mxu1 }
 0x35b   :  { %1692 = vst.msk [vmem:[#allocation10 + $0x78] sm:$0xff] %vm123_vm0, %v1935_v24  ;;  %v1668_v25 = vpop.f32.mrb[15].mxu1 }
 0x35c   :  { %1691 = vst.msk [vmem:[#allocation10 + $0x70] sm:$0xff] %vm123_vm0, %v1668_v25 }
 0x35d   :  { %2186 = shalt.err (!%p2183_p8)
}
 0x35e   :  { %s2187_s15 = scalar_lea.hbm %s2596_s4, 2048 }
 0x35f   :  { %p2188_p9 = scmp.ne.s32.totalorder %s2596_s4, %s2187_s15  ;;  %p2191_p10 = scmp.lt.u32.totalorder %s2187_s15, %s2596_s4 }
 0x361   :  { %p2193_p11 = pnand %p2191_p10, %p2188_p9 }
 0x363   :  { %2196 = shalt.err (!%p2193_p11)
}
 0x364   :  { %1704 = dma.vmem_to_hbm [thread:$0]  %s1699_s12, 2048, %s2596_s4, [#allocation4], %s2207_s27, %s2207_s27, %s2208_s28  }
 0x365   :  { %2203 = dma.done.wait [#allocation4], 2048  }
 0x366   :  { %2204 = vsyncadd [#allocation4], 4294965248 }
 0x367   :  { %1708 = vsyncpa [#allocation3], 1 }
 0x368   :  { %1709 = vsyncpa [#allocation6], 1 }
 0x369   :  { %1710 = vsyncpa [#allocation9], 1 }
 0x36a   :  { %1711 = vsyncpa [#allocation4], 1 }

</bundles_post_ra>
